<compile_context>
chip_gen: v6e
topology: v6e:2x2x1
jax: 0.10.0
libtpu: 0.0.40
codegen_flags: <defaults>
</compile_context>

<pallas_src>
import functools
import math

import jax
import jax.numpy as jnp
from jax import lax
from jax.experimental import pallas as pl
from jax.experimental.pallas import tpu as pltpu


# ----------------------------- tiled linear kernel ---------------------------

_TM, _TN, _TK = 128, 128, 512  # default tile targets (re-derive for v7x VMEM if needed)


def _pick_tile(dim, target):
    """Use `target` if it divides `dim`, else fall back to the full extent."""
    return target if dim % target == 0 else dim


def _linear_kernel(x_ref, w_ref, b_ref, o_ref, acc_ref):
    # x: (tm, tk), w: (tn, tk)  [PyTorch Linear layout], b: (1, tn)
    k = pl.program_id(2)

    @pl.when(k == 0)
    def _():
        acc_ref[...] = jnp.zeros_like(acc_ref)

    acc_ref[...] += lax.dot_general(
        x_ref[...], w_ref[...],
        dimension_numbers=(((1,), (1,)), ((), ())),   # contract on d_in, no .T
        preferred_element_type=jnp.float32)

    @pl.when(k == pl.num_programs(2) - 1)
    def _():
        o_ref[...] = (acc_ref[...] + b_ref[...].astype(jnp.float32)).astype(o_ref.dtype)


def pallas_linear(x2d, w, b, *, tm=_TM, tn=_TN, tk=_TK):
    """x2d: (M, d_in), w: (d_out, d_in), b: (d_out,) -> (M, d_out)."""
    M, K = x2d.shape
    N = w.shape[0]
    tm, tn, tk = _pick_tile(M, tm), _pick_tile(N, tn), _pick_tile(K, tk)
    b2d = b.reshape(1, N)
    return pl.pallas_call(
        _linear_kernel,
        out_shape=jax.ShapeDtypeStruct((M, N), x2d.dtype),
        grid=(M // tm, N // tn, K // tk),
        in_specs=[
            pl.BlockSpec((tm, tk), lambda i, j, k: (i, k)),
            pl.BlockSpec((tn, tk), lambda i, j, k: (j, k)),
            pl.BlockSpec((1, tn), lambda i, j, k: (0, j)),
        ],
        out_specs=pl.BlockSpec((tm, tn), lambda i, j, k: (i, j)),
        scratch_shapes=[pltpu.VMEM((tm, tn), jnp.float32)],
        compiler_params=pltpu.CompilerParams(
            dimension_semantics=("parallel", "parallel", "arbitrary")),
    )(x2d, w, b2d)


# --------------------------- flash attention kernel --------------------------


def _flash_attn_kernel(q_ref, k_ref, v_ref, o_ref, m_sc, l_sc, acc_sc, *, num_heads):
    # q_ref: (S, d_model), k_ref/v_ref: (tk, d_model), o_ref: (S, d_model).
    # Online softmax over the KV-tile grid axis; heads are statically unrolled
    # so every op is a 2-D lane-dense tile (safe + MXU-friendly).
    kv_i = pl.program_id(1)
    S, d_model = q_ref.shape
    d_k = d_model // num_heads
    scale = 1.0 / math.sqrt(d_k)

    @pl.when(kv_i == 0)
    def _():
        m_sc[...] = jnp.full_like(m_sc, -jnp.inf)
        l_sc[...] = jnp.zeros_like(l_sc)
        acc_sc[...] = jnp.zeros_like(acc_sc)

    for hd in range(num_heads):
        sl = slice(hd * d_k, (hd + 1) * d_k)
        qh = q_ref[:, sl] * scale                     # pre-scale Q, not the scores
        kh = k_ref[:, sl]
        vh = v_ref[:, sl]
        s = lax.dot_general(qh, kh, (((1,), (1,)), ((), ())),
                            preferred_element_type=jnp.float32)       # (S, tk)
        m_prev = m_sc[hd]                             # (S, 1)
        m_new = jnp.maximum(m_prev, s.max(axis=-1, keepdims=True))
        alpha = jnp.exp(m_prev - m_new)
        p = jnp.exp(s - m_new)
        l_sc[hd] = alpha * l_sc[hd] + p.sum(axis=-1, keepdims=True)
        acc_sc[hd] = alpha * acc_sc[hd] + lax.dot_general(
            p.astype(vh.dtype), vh, (((1,), (0,)), ((), ())),
            preferred_element_type=jnp.float32)
        m_sc[hd] = m_new

    @pl.when(kv_i == pl.num_programs(1) - 1)
    def _():
        for hd in range(num_heads):
            inv_l = pl.reciprocal(l_sc[hd])           # EUP, avoids S*d_k divides
            o_ref[:, hd * d_k:(hd + 1) * d_k] = (acc_sc[hd] * inv_l).astype(o_ref.dtype)


def pallas_flash_attention(q_arr, k_arr, v_arr, *, num_heads, d_model,
                           chunks=(0, 0, 0), block_kv=256):
    """q/k/v arrays: (B, S, C) with the relevant d_model chunk selected by
    `chunks` (lets the fused (B, S, 3*d_model) QKV tensor be read in place).
    Returns (B, S, d_model)."""
    B, S, _ = q_arr.shape
    d_k = d_model // num_heads
    block_kv = min(block_kv, S)
    if S % block_kv != 0 or (block_kv % 8 != 0 and block_kv != S):
        block_kv = S                                  # single KV tile fallback
    num_kv = S // block_kv
    cq, ck, cv = chunks
    kernel = functools.partial(_flash_attn_kernel, num_heads=num_heads)
    return pl.pallas_call(
        kernel,
        out_shape=jax.ShapeDtypeStruct((B, S, d_model), q_arr.dtype),
        grid=(B, num_kv),
        in_specs=[
            pl.BlockSpec((None, S, d_model), lambda b, kv: (b, 0, cq)),
            pl.BlockSpec((None, block_kv, d_model), lambda b, kv: (b, kv, ck)),
            pl.BlockSpec((None, block_kv, d_model), lambda b, kv: (b, kv, cv)),
        ],
        out_specs=pl.BlockSpec((None, S, d_model), lambda b, kv: (b, 0, 0)),
        scratch_shapes=[
            pltpu.VMEM((num_heads, S, 1), jnp.float32),      # running max m
            pltpu.VMEM((num_heads, S, 1), jnp.float32),      # running denom l
            pltpu.VMEM((num_heads, S, d_k), jnp.float32),    # output accumulator
        ],
        compiler_params=pltpu.CompilerParams(
            dimension_semantics=("parallel", "arbitrary")),
    )(q_arr, k_arr, v_arr)


# ------------------ full-score attention (optional p_attn path) --------------


def _attn_probs_kernel(q_ref, k_ref, v_ref, o_ref, p_ref, *, num_heads):
    S, d_model = q_ref.shape
    d_k = d_model // num_heads
    scale = 1.0 / math.sqrt(d_k)
    for hd in range(num_heads):
        sl = slice(hd * d_k, (hd + 1) * d_k)
        qh = q_ref[:, sl] * scale
        kh = k_ref[:, sl]
        vh = v_ref[:, sl]
        s = lax.dot_general(qh, kh, (((1,), (1,)), ((), ())),
                            preferred_element_type=jnp.float32)       # (S, S)
        m = s.max(axis=-1, keepdims=True)
        e = jnp.exp(s - m)
        p = e * pl.reciprocal(e.sum(axis=-1, keepdims=True))
        p_ref[hd] = p.astype(p_ref.dtype)
        o_ref[:, sl] = lax.dot_general(
            p.astype(vh.dtype), vh, (((1,), (0,)), ((), ())),
            preferred_element_type=jnp.float32).astype(o_ref.dtype)


def pallas_attention_with_probs(q_arr, k_arr, v_arr, *, num_heads, d_model,
                                chunks=(0, 0, 0)):
    B, S, _ = q_arr.shape
    cq, ck, cv = chunks
    kernel = functools.partial(_attn_probs_kernel, num_heads=num_heads)
    return pl.pallas_call(
        kernel,
        out_shape=(
            jax.ShapeDtypeStruct((B, S, d_model), q_arr.dtype),
            jax.ShapeDtypeStruct((B, num_heads, S, S), q_arr.dtype),
        ),
        grid=(B,),
        in_specs=[
            pl.BlockSpec((None, S, d_model), lambda b: (b, 0, cq)),
            pl.BlockSpec((None, S, d_model), lambda b: (b, 0, ck)),
            pl.BlockSpec((None, S, d_model), lambda b: (b, 0, cv)),
        ],
        out_specs=(
            pl.BlockSpec((None, S, d_model), lambda b: (b, 0, 0)),
            pl.BlockSpec((None, num_heads, S, S), lambda b: (b, 0, 0, 0)),
        ),
        compiler_params=pltpu.CompilerParams(dimension_semantics=("parallel",)),
    )(q_arr, k_arr, v_arr)


# ------------------------------ module forward --------------------------------


def multi_headed_attention(query, key, value, params, h, *,
                           return_attn=False, block_kv=256):
    """Forward pass matching PyTorch MultiHeadedAttention (eval mode).

    query/key/value: (B, S, d_model)
    params: list of 4 (W, b) pairs, W: (d_model, d_model), b: (d_model,)
    Returns output (B, S, d_model); with return_attn=True also (B, h, S, S).
    """
    B, S, d_model = query.shape
    M = B * S
    self_attn = (query is key) and (key is value) and (d_model % 128 == 0)

    if self_attn:
        # Fused QKV projection: one tiled pallas_call over concatenated weights.
        w_qkv = jnp.concatenate([params[0][0], params[1][0], params[2][0]], axis=0)
        b_qkv = jnp.concatenate([params[0][1], params[1][1], params[2][1]], axis=0)
        qkv = pallas_linear(query.reshape(M, d_model), w_qkv, b_qkv)
        qkv = qkv.reshape(B, S, 3 * d_model)
        q_arr = k_arr = v_arr = qkv
        chunks = (0, 1, 2)        # q/k/v chunks sliced via BlockSpec, no HBM split
    else:
        proj = [
            pallas_linear(x.reshape(M, d_model), w, b).reshape(B, S, d_model)
            for (w, b), x in zip(params[:3], (query, key, value))
        ]
        q_arr, k_arr, v_arr = proj
        chunks = (0, 0, 0)

    if return_attn:
        x, p_attn = pallas_attention_with_probs(
            q_arr, k_arr, v_arr, num_heads=h, d_model=d_model, chunks=chunks)
    else:
        x = pallas_flash_attention(
            q_arr, k_arr, v_arr, num_heads=h, d_model=d_model,
            chunks=chunks, block_kv=block_kv)
        p_attn = None

    w_o, b_o = params[3]
    out = pallas_linear(x.reshape(M, d_model), w_o, b_o).reshape(B, S, d_model)
    return (out, p_attn) if return_attn else out


# --------------------------------- reference ----------------------------------


def reference_mha(query, key, value, params, h):
    B, S, d_model = query.shape
    d_k = d_model // h
    proj = []
    for (w, b), x in zip(params[:3], (query, key, value)):
        y = x.reshape(B * S, d_model) @ w.T + b
        proj.append(y.reshape(B, S, h, d_k).transpose(0, 2, 1, 3))
    q, k, v = proj
    scores = jnp.einsum("bhqd,bhkd->bhqk", q, k) / math.sqrt(d_k)
    p = jax.nn.softmax(scores, axis=-1)
    x = jnp.einsum("bhqk,bhkd->bhqd", p, v)
    x = x.transpose(0, 2, 1, 3).reshape(B * S, d_model)
    w_o, b_o = params[3]
    return (x @ w_o.T + b_o).reshape(B, S, d_model), p


# ----------------------------------- main --------------------------------------

if __name__ == "__main__":
    B, S, d_model, h = 2, 16, 128, 4

    key0 = jax.random.PRNGKey(0)
    keys = jax.random.split(key0, 12)

    bound = 1.0 / math.sqrt(d_model)
    params = []
    for i in range(4):
        w = jax.random.uniform(keys[2 * i], (d_model, d_model),
                               minval=-bound, maxval=bound, dtype=jnp.float32)
        b = jax.random.uniform(keys[2 * i + 1], (d_model,),
                               minval=-bound, maxval=bound, dtype=jnp.float32)
        params.append((w, b))

    x_self = jax.random.normal(keys[8], (B, S, d_model), dtype=jnp.float32)
    key_in = jax.random.normal(keys[9], (B, S, d_model), dtype=jnp.float32)
    val_in = jax.random.normal(keys[10], (B, S, d_model), dtype=jnp.float32)

    # 1) Self-attention fast path: fused QKV + flash attention (2 KV tiles).
    out = multi_headed_attention(x_self, x_self, x_self, params, h, block_kv=8)
    out = jax.block_until_ready(out)
    ref_out, ref_attn = reference_mha(x_self, x_self, x_self, params, h)
    assert out.shape == (B, S, d_model)
    assert jnp.allclose(out, ref_out, atol=2e-4, rtol=2e-4)

    # 2) Optional attention-probability output (full-score kernel).
    out2, attn2 = multi_headed_attention(x_self, x_self, x_self, params, h,
                                         return_attn=True)
    out2, attn2 = jax.block_until_ready((out2, attn2))
    assert attn2.shape == (B, h, S, S)
    assert jnp.allclose(out2, ref_out, atol=2e-4, rtol=2e-4)
    assert jnp.allclose(attn2, ref_attn, atol=2e-4, rtol=2e-4)

    # 3) Cross-attention (distinct q/k/v): separate projection path.
    out3 = multi_headed_attention(x_self, key_in, val_in, params, h, block_kv=8)
    out3 = jax.block_until_ready(out3)
    ref_out3, _ = reference_mha(x_self, key_in, val_in, params, h)
    assert jnp.allclose(out3, ref_out3, atol=2e-4, rtol=2e-4)

    print("KERNEL_OK")
</pallas_src>

<mosaic_0001>
module attributes {stable_mosaic.version = 11 : i64} {
  func.func @_linear_kernel(%arg0: i32, %arg1: i32, %arg2: i32, %arg3: memref<32x128xf32, #tpu.memory_space<vmem>>, %arg4: memref<128x128xf32, #tpu.memory_space<vmem>>, %arg5: memref<1x128xf32, #tpu.memory_space<vmem>>, %arg6: memref<32x128xf32, #tpu.memory_space<vmem>>, %arg7: memref<32x128xf32, #tpu.memory_space<vmem>>) attributes {dimension_semantics = [#tpu.dimension_semantics<parallel>, #tpu.dimension_semantics<parallel>, #tpu.dimension_semantics<arbitrary>], iteration_bounds = array<i64: 1, 3, 1>, scalar_prefetch = 0 : i64, scratch_operands = 1 : i64, tpu.core_type = #tpu.core_type<tc>, window_params = [{transform_indices = @transform_0, window_bounds = array<i64: 32, 128>}, {transform_indices = @transform_1, window_bounds = array<i64: 128, 128>}, {transform_indices = @transform_2, window_bounds = array<i64: 1, 128>}, {transform_indices = @transform_3, window_bounds = array<i64: 32, 128>}]} {
    %c0_i32 = arith.constant 0 : i32
    %0 = arith.cmpi eq, %arg2, %c0_i32 : i32
    %1 = arith.extui %0 : i1 to i32
    %c0_i32_0 = arith.constant 0 : i32
    %2 = arith.cmpi ne, %1, %c0_i32_0 : i32
    scf.if %2 {
      %cst_10 = arith.constant 0.000000e+00 : f32
      %12 = vector.broadcast %cst_10 : f32 to vector<32x128xf32>
      %c0_11 = arith.constant 0 : index
      %c0_12 = arith.constant 0 : index
      %13 = vector.load %arg7[%c0_11, %c0_12] : memref<32x128xf32, #tpu.memory_space<vmem>>, vector<32x128xf32>
      tpu.vector_store %arg7[%c0_11, %c0_12], %12 {strides = array<i32>} : memref<32x128xf32, #tpu.memory_space<vmem>>, vector<32x128xf32>,
    } else {
    }
    %c0 = arith.constant 0 : index
    %c0_1 = arith.constant 0 : index
    %3 = vector.load %arg7[%c0, %c0_1] : memref<32x128xf32, #tpu.memory_space<vmem>>, vector<32x128xf32>
    %c0_2 = arith.constant 0 : index
    %c0_3 = arith.constant 0 : index
    %4 = vector.load %arg3[%c0_2, %c0_3] : memref<32x128xf32, #tpu.memory_space<vmem>>, vector<32x128xf32>
    %c0_4 = arith.constant 0 : index
    %c0_5 = arith.constant 0 : index
    %5 = vector.load %arg4[%c0_4, %c0_5] : memref<128x128xf32, #tpu.memory_space<vmem>>, vector<128x128xf32>
    %cst = arith.constant dense<0.000000e+00> : vector<32x128xf32>
    %6 = tpu.matmul %4, %5, %cst {dimension_numbers = #tpu.dot_dimension_numbers<[1], [1], [0], [0], [0, 0, 1, 0], [], []>} : vector<32x128xf32>, vector<128x128xf32>, vector<32x128xf32> -> vector<32x128xf32>
    %7 = arith.addf %3, %6 : vector<32x128xf32>
    %c0_6 = arith.constant 0 : index
    %c0_7 = arith.constant 0 : index
    %8 = vector.load %arg7[%c0_6, %c0_7] : memref<32x128xf32, #tpu.memory_space<vmem>>, vector<32x128xf32>
    tpu.vector_store %arg7[%c0_6, %c0_7], %7 {strides = array<i32>} : memref<32x128xf32, #tpu.memory_space<vmem>>, vector<32x128xf32>,
    %c0_i32_8 = arith.constant 0 : i32
    %9 = arith.cmpi eq, %arg2, %c0_i32_8 : i32
    %10 = arith.extui %9 : i1 to i32
    %c0_i32_9 = arith.constant 0 : i32
    %11 = arith.cmpi ne, %10, %c0_i32_9 : i32
    scf.if %11 {
      %c0_10 = arith.constant 0 : index
      %c0_11 = arith.constant 0 : index
      %12 = vector.load %arg7[%c0_10, %c0_11] : memref<32x128xf32, #tpu.memory_space<vmem>>, vector<32x128xf32>
      %c0_12 = arith.constant 0 : index
      %c0_13 = arith.constant 0 : index
      %13 = vector.load %arg5[%c0_12, %c0_13] : memref<1x128xf32, #tpu.memory_space<vmem>>, vector<1x128xf32>
      %14 = vector.broadcast %13 : vector<1x128xf32> to vector<32x128xf32>
      %15 = arith.addf %12, %14 : vector<32x128xf32>
      %c0_14 = arith.constant 0 : index
      %c0_15 = arith.constant 0 : index
      %16 = vector.load %arg6[%c0_14, %c0_15] : memref<32x128xf32, #tpu.memory_space<vmem>>, vector<32x128xf32>
      tpu.vector_store %arg6[%c0_14, %c0_15], %15 {strides = array<i32>} : memref<32x128xf32, #tpu.memory_space<vmem>>, vector<32x128xf32>,
    } else {
    }
    return
  }
  func.func @transform_0(%arg0: i32, %arg1: i32, %arg2: i32) -> (i32, i32) {
    %c0_i32 = arith.constant 0 : i32
    return %arg0, %arg2 : i32, i32
  }
  func.func @transform_1(%arg0: i32, %arg1: i32, %arg2: i32) -> (i32, i32) {
    %c0_i32 = arith.constant 0 : i32
    return %arg1, %arg2 : i32, i32
  }
  func.func @transform_2(%arg0: i32, %arg1: i32, %arg2: i32) -> (i32, i32) {
    %c0_i32 = arith.constant 0 : i32
    %c0_i32_0 = arith.constant 0 : i32
    return %c0_i32, %arg1 : i32, i32
  }
  func.func @transform_3(%arg0: i32, %arg1: i32, %arg2: i32) -> (i32, i32) {
    %c0_i32 = arith.constant 0 : i32
    return %arg0, %arg1 : i32, i32
  }
}

</mosaic_0001>

<bundles_post_ra>
// kernel: tpu_custom_call.1
= control target key start
LH: loop header
LB: loop body
LE: loop exit
PB: predicated region body
PF: predicated region fallthrough
CT: control target
= control target key end

     0   :  { %8 = vsyncpa [#allocation4], 0  ;;  %s1095_s0 = inlined_call_operand.hbm [shape: f32[32,128], index: 0, kind: input, shape index: {}]   ;;  %s1096_s1 = inlined_call_operand.hbm [shape: f32[384,128], index: 1, kind: input, shape index: {}]   ;;  %s1097_s2 = inlined_call_operand.vmem [shape: f32[1,384], index: 2, kind: input, shape index: {}]   ;;  %s1098_s3 = inlined_call_operand.hbm [shape: f32[32,384], index: 3, kind: output, shape index: {}]  }
   0x1   :  { %9 = vsyncpa [#allocation7], 0 }
   0x2   :  { %11 = vsyncpa [#allocation7 + $0x1], 0 }
   0x3   :  { %12 = vsyncpa [#allocation5], 0 }
   0x4   :  { %14 = vsyncpa [#allocation5 + $0x1], 0  ;;  %s886_s12 = smov 0   ;;  %s888_s13 = smov 0  }
   0x5   :  { %s890_s14 = smov 0   ;;  %s892_s15 = smov 0  }
   0x6   :  { %s894_s16 = smov 0   ;;  %s896_s17 = smov 0  }
   0x7 LB: > { %s532_s18 = sadd.s32 4294967295, %s856_s17   ;;  %s533_s19 = sadd.s32 4294967294, %s856_s17   ;;  %s856_s17 = sphi %s896_s17, %s20_s17   ;;  %s852_s16 = sphi %s894_s16, %s1119_s16   ;;  %s848_s15 = sphi %s892_s15, %s1118_s15   ;;  %s844_s14 = sphi %s890_s14, %s1117_s14   ;;  %s840_s13 = sphi %s888_s13, %s1116_s13   ;;  %s836_s12 = sphi %s886_s12, %s1115_s12  }
   0x8   : > { %p89_p0 = scmp.ne.s32.totalorder %s840_s13, %s836_s12  ;;  %p920_p1 = scmp.eq.s32.totalorder %s532_s18, 0 }
   0x9   : > { %p924_p2 = scmp.eq.s32.totalorder %s532_s18, 2  ;;  %p147_p3 = scmp.eq.s32.totalorder %s533_s19, 2 }
   0xa   : > { %p930_p4 = por %p920_p1, %p89_p0  ;;  %p534_p5 = scmp.ge.s32.totalorder %s856_s17, 1 }
   0xb   : > { %p935_p6 = por %p147_p3, %p89_p0  ;;  %p154_p7 = scmp.lt.s32.totalorder %s856_s17, 4 }
   0xc   : > { %s858_s25 = smov [#allocation3]   ;;  %s35_s28 = sadd.s32 1, %s852_s16 }
   0xd   : > { %s1105_s23 = scalar_select %p935_p6, 1, 0 }
   0xe   : > { %p940_p8 = pnand %p534_p5, %p154_p7  ;;  %s170_s26 = sshll.u32 %s858_s25, 4  ;;  %s171_s26 = int_to_ptr.vmem [resolvable:$true] %s170_s26 }
   0xf   : > { %s729_s29 = scalar_lea.vmem %s171_s26, 512  ;;  %p737_p3 = scmp.lt.s32.totalorder %s171_s26, %s171_s26 }
  0x10   : > { %p648_p9 = pneg %p940_p8  ;;  %p730_p12 = scmp.ne.s32.totalorder %s171_s26, %s729_s29 }
  0x11   : > { %p738_p5 = scmp.lt.s32.totalorder %s729_s29, %s729_s29 }
  0x12   : > { %p948_p10 = pnand %p648_p9, %p920_p1 }
  0x13   : > { %p739_p7 = por %p738_p5, %p737_p3 }
  0x14   : > { %p720_p11 = pneg %p948_p10 }
  0x16   : > { %p732_p13 = pnand %p730_p12, %p720_p11 }
  0x18   : > { %p733_p0 = pneg %p732_p13 }
  0x1a   : > { %p740_p6 = pnand %p739_p7, %p733_p0 }
  0x1c   : > { %743 = shalt.err (!%p740_p6)
}
  0x1d   : > { %s1099_s30 = smov 128   ;;  %s1100_s4 = smov 8  }
  0x1e   : > { %651 = dma.hbm_to_vmem [thread:$0]  (!%p948_p10), %s1095_s0, 512, %s171_s26, [#allocation4], %s1099_s30, %s1099_s30, %s1100_s4  }
  0x1f   : > { %p37_p6 = scmp.ge.s32.totalorder %s35_s28, 3  ;;  %s76_s7 = sadd.s32 1, %s844_s14 }
  0x20   : > { %p83_p9 = scmp.ne.s32.totalorder %s844_s14, %s840_s13  ;;  %p84_p11 = scmp.eq.s32.totalorder %s856_s17, 0 }
  0x21   : > { %s1121_s28 = smov (%p37_p6, %s35_s28), 0  ;;  %p661_p0 = scmp.lt.s32.totalorder %s856_s17, 3 }
  0x22   : > { %p969_p12 = por %p84_p11, %p83_p9  ;;  %p975_p13 = por %p924_p2, %p83_p9 }
  0x23   : > { %s71_s10 = ssub.s32 %s852_s16, %s1121_s28  ;;  %s184_s11 = sand.u32 1, %s844_s14  }
  0x24   : > { %s1109_s9 = scalar_select %p975_p13, 1, 0 }
  0x25   : > { %p74_p10 = scmp.eq.s32.totalorder %s71_s10, 0  ;;  %s537_s18 = sshll.u32 %s184_s11, 7 }
  0x26   : > { %s549_s25 = sshll.u32 %s852_s16, 11  ;;  %s188_s5 = scalar_lea.vmem [#allocation6], %s537_s18 }
  0x27   : > { %s984_s19 = scalar_select %p74_p10, %s844_s14, %s76_s7  }
  0x28   : > { %s195_s29 = scalar_lea.hbm %s1096_s1, %s549_s25  ;;  %s196_s6 = sshll.u32 %s188_s5, 4  ;;  %s197_s6 = int_to_ptr.vmem [resolvable:$true] %s196_s6 }
  0x29   : > { %p992_p2 = pnand %p661_p0, %p969_p12  ;;  %s185_s30 = scalar_lea.sflag [#allocation7], %s184_s11 }
  0x2a   : > { %s757_s10 = scalar_lea.vmem %s197_s6, 2048  ;;  %s861_s7 = smov [#allocation6]  }
  0x2b   : > { %p746_p3 = pneg %p992_p2  ;;  %p758_p5 = scmp.ne.s32.totalorder %s197_s6, %s757_s10 }
  0x2c   : > { %s762_s4 = sshll.u32 %s861_s7, 4  ;;  %s763_s4 = int_to_ptr.vmem [resolvable:$false] %s762_s4 }
  0x2d   : > { %p760_p7 = pnand %p758_p5, %p746_p3  ;;  %s764_s25 = scalar_lea.vmem %s763_s4, 4096 }
  0x2e   : > { %p765_p9 = scmp.lt.s32.totalorder %s197_s6, %s763_s4  ;;  %p766_p11 = scmp.lt.s32.totalorder %s764_s25, %s757_s10 }
  0x2f   : > { %p761_p6 = pneg %p760_p7 }
  0x30   : > { %p767_p10 = por %p766_p11, %p765_p9 }
  0x32   : > { %p768_p13 = pnand %p767_p10, %p761_p6 }
  0x34   : > { %771 = shalt.err (!%p768_p13)
}
  0x35   : > { %s1111_s8 = smov 8   ;;  %s1112_s18 = smov 128  }
  0x36   : > { %655 = dma.hbm_to_vmem [thread:$0]  (!%p992_p2), %s195_s29, 2048, %s197_s6, %s185_s30, %s1112_s18, %s1112_s18, %s1111_s8  }
  0x37   : > { %214 = sbr.rel (%p940_p8) target bundleno = 342 (0x156), region = 32 }
  0x3c   : > { %823 = dma.done.wait (%p920_p1), [#allocation4], 512  }
  0x3d   : > { %825 = vsyncadd (%p920_p1), [#allocation4], 4294966784  ;;  %s1010_s4 = sand.u32 1, %s840_s13  }
  0x3e   : > { %s542_s11 = sshll.u32 %s1010_s4, 7  ;;  %s221_s26 = scalar_lea.sflag [#allocation7], %s1010_s4 }
  0x3f   : > { %s1014_s27 = scalar_lea.vmem [#allocation6], %s542_s11 }
  0x40   : > { %827 = dma.done.wait (%p930_p4), %s221_s26, 2048  }
  0x41   : > { %829 = vsyncadd (%p930_p4), %s221_s26, 4294965248  ;;  %v287_v0 = vld [vmem:[%s1014_s27 + $0x78] sm:$0xff]  ;;  %v286_v1 = vld [vmem:[%s1014_s27 + $0x70] sm:$0xff]  ;;  %p252_p1 = scmp.lt.s32.totalorder %s848_s15, 2  ;;  %s543_s22 = sshll.u32 %s1010_s4, 5 }
  0x42   : > { %570 = vmatprep.subr.mxu0 %v287_v0  ;;  %608 = vmatprep.subr.mxu1 %v287_v0  ;;  %v285_v2 = vld [vmem:[%s1014_s27 + $0x68] sm:$0xff]  ;;  %v268_v3 = vld [vmem:[#allocation3] sm:$0xff]  ;;  %v270_v4 = vld [vmem:[#allocation3 + $0x10] sm:$0xff]  ;;  %s249_s5 = scalar_lea.vmem [#allocation8], %s543_s22  ;;  %s546_s21 = sshll.u32 %s848_s15, 7 }
  0x43   : > { %571 = vmatpush3.xpose.msra.mxu0 %v287_v0  ;;  %624 = vmatpush3.xpose.msra.mxu1 %v287_v0  ;;  %v284_v5 = vld [vmem:[%s1014_s27 + $0x60] sm:$0xff]  ;;  %v283_v6 = vld [vmem:[%s1014_s27 + $0x58] sm:$0xff]  ;;  %v282_v7 = vld [vmem:[%s1014_s27 + $0x50] sm:$0xff]  ;;  %s253_s20 = scalar_select %p252_p1, %s848_s15, 2 }
  0x44   : > { %572 = vmatprep.subr.mxu0 %v286_v1  ;;  %609 = vmatprep.subr.mxu1 %v286_v1  ;;  %v281_v8 = vld [vmem:[%s1014_s27 + $0x48] sm:$0xff]  ;;  %v280_v9 = vld [vmem:[%s1014_s27 + $0x40] sm:$0xff]  ;;  %v279_v10 = vld [vmem:[%s1014_s27 + $0x38] sm:$0xff]  ;;  %s419_s6 = sshll.u32 %s249_s5, 4  ;;  %s1048_s25 = scalar_lea.hbm %s1098_s3, %s546_s21  ;;  %s1043_s6 = int_to_ptr.vmem [resolvable:$true] %s419_s6 }
  0x45   : > { %602 = vmatprep.mubr.f32.mxu0 %v268_v3  ;;  %605 = vmatprep.mubr.f32.mxu1 %v270_v4  ;;  %v278_v11 = vld [vmem:[%s1014_s27 + $0x30] sm:$0xff]  ;;  %v277_v12 = vld [vmem:[%s1014_s27 + $0x28] sm:$0xff]  ;;  %v276_v13 = vld [vmem:[%s1014_s27 + $0x20] sm:$0xff]  ;;  %s254_s29 = scalar_lea.vmem %s1097_s2, %s253_s20  ;;  %s404_s15 = scalar_lea.sflag [#allocation5], %s1010_s4 }
  0x46   : > { %v275_v14 = vld [vmem:[%s1014_s27 + $0x18] sm:$0xff]  ;;  %v274_v15 = vld [vmem:[%s1014_s27 + $0x10] sm:$0xff]  ;;  %v273_v16 = vld [vmem:[%s1014_s27 + $0x8] sm:$0xff]  ;;  %s772_s8 = scalar_lea.vmem %s1043_s6, 512  ;;  %p1113_p8 = scmp.ne.s32.totalorder %s1109_s9, 0 }
  0x47   : > { %573 = vmatpush3.xpose.msra.mxu0 %v286_v1  ;;  %625 = vmatpush3.xpose.msra.mxu1 %v286_v1  ;;  %v272_v17 = vld [vmem:[%s1014_s27] sm:$0xff]  ;;  %v269_v18 = vld [vmem:[#allocation3 + $0x8] sm:$0xff]  ;;  %v271_v19 = vld [vmem:[#allocation3 + $0x18] sm:$0xff]  ;;  %p773_p4 = scmp.ne.s32.totalorder %s1043_s6, %s772_s8  ;;  %s862_s18 = smov [#allocation8]  }
  0x48   : > { %574 = vmatprep.subr.mxu0 %v285_v2  ;;  %610 = vmatprep.subr.mxu1 %v285_v2  ;;  %v544_v20 = vld [vmem:[%s254_s29] ss:$0 sm:$0xff]  ;;  %s776_s11 = sshll.u32 %s862_s18, 4  ;;  %s777_s11 = int_to_ptr.vmem [resolvable:$false] %s776_s11 }
  0x49   : > { %p774_p12 = pnand %p773_p4, %p1113_p8  ;;  %s778_s26 = scalar_lea.vmem %s777_s11, 1024 }
  0x4a   : > { %p779_p0 = scmp.lt.s32.totalorder %s1043_s6, %s777_s11  ;;  %p780_p2 = scmp.lt.s32.totalorder %s778_s26, %s772_s8 }
  0x4b   : > { %575 = vmatpush3.xpose.msra.mxu0 %v285_v2  ;;  %626 = vmatpush3.xpose.msra.mxu1 %v285_v2  ;;  %p775_p13 = pneg %p774_p12 }
  0x4c   : > { %576 = vmatprep.subr.mxu0 %v284_v5  ;;  %611 = vmatprep.subr.mxu1 %v284_v5  ;;  %p781_p3 = por %p780_p2, %p779_p0 }
  0x4e   : > { %p782_p5 = pnand %p781_p3, %p775_p13 }
  0x4f   : > { %577 = vmatpush3.xpose.msra.mxu0 %v284_v5  ;;  %627 = vmatpush3.xpose.msra.mxu1 %v284_v5 }
  0x50   : > { %578 = vmatprep.subr.mxu0 %v283_v6  ;;  %612 = vmatprep.subr.mxu1 %v283_v6 }
  0x53   : > { %579 = vmatpush3.xpose.msra.mxu0 %v283_v6  ;;  %628 = vmatpush3.xpose.msra.mxu1 %v283_v6 }
  0x54   : > { %580 = vmatprep.subr.mxu0 %v282_v7  ;;  %613 = vmatprep.subr.mxu1 %v282_v7 }
  0x57   : > { %581 = vmatpush3.xpose.msra.mxu0 %v282_v7  ;;  %629 = vmatpush3.xpose.msra.mxu1 %v282_v7 }
  0x58   : > { %582 = vmatprep.subr.mxu0 %v281_v8  ;;  %614 = vmatprep.subr.mxu1 %v281_v8 }
  0x5b   : > { %583 = vmatpush3.xpose.msra.mxu0 %v281_v8  ;;  %630 = vmatpush3.xpose.msra.mxu1 %v281_v8 }
  0x5c   : > { %584 = vmatprep.subr.mxu0 %v280_v9  ;;  %615 = vmatprep.subr.mxu1 %v280_v9 }
  0x5f   : > { %585 = vmatpush3.xpose.msra.mxu0 %v280_v9  ;;  %631 = vmatpush3.xpose.msra.mxu1 %v280_v9 }
  0x60   : > { %586 = vmatprep.subr.mxu0 %v279_v10  ;;  %616 = vmatprep.subr.mxu1 %v279_v10 }
  0x63   : > { %587 = vmatpush3.xpose.msra.mxu0 %v279_v10  ;;  %632 = vmatpush3.xpose.msra.mxu1 %v279_v10 }
  0x64   : > { %588 = vmatprep.subr.mxu0 %v278_v11  ;;  %617 = vmatprep.subr.mxu1 %v278_v11 }
  0x67   : > { %589 = vmatpush3.xpose.msra.mxu0 %v278_v11  ;;  %633 = vmatpush3.xpose.msra.mxu1 %v278_v11 }
  0x68   : > { %590 = vmatprep.subr.mxu0 %v277_v12  ;;  %618 = vmatprep.subr.mxu1 %v277_v12 }
  0x6b   : > { %591 = vmatpush3.xpose.msra.mxu0 %v277_v12  ;;  %634 = vmatpush3.xpose.msra.mxu1 %v277_v12 }
  0x6c   : > { %592 = vmatprep.subr.mxu0 %v276_v13  ;;  %619 = vmatprep.subr.mxu1 %v276_v13 }
  0x6f   : > { %593 = vmatpush3.xpose.msra.mxu0 %v276_v13  ;;  %635 = vmatpush3.xpose.msra.mxu1 %v276_v13 }
  0x70   : > { %594 = vmatprep.subr.mxu0 %v275_v14  ;;  %620 = vmatprep.subr.mxu1 %v275_v14 }
  0x73   : > { %595 = vmatpush3.xpose.msra.mxu0 %v275_v14  ;;  %636 = vmatpush3.xpose.msra.mxu1 %v275_v14 }
  0x74   : > { %596 = vmatprep.subr.mxu0 %v274_v15  ;;  %621 = vmatprep.subr.mxu1 %v274_v15 }
  0x77   : > { %597 = vmatpush3.xpose.msra.mxu0 %v274_v15  ;;  %637 = vmatpush3.xpose.msra.mxu1 %v274_v15 }
  0x78   : > { %598 = vmatprep.subr.mxu0 %v273_v16  ;;  %622 = vmatprep.subr.mxu1 %v273_v16 }
  0x7b   : > { %599 = vmatpush3.xpose.msra.mxu0 %v273_v16  ;;  %638 = vmatpush3.xpose.msra.mxu1 %v273_v16 }
  0x7c   : > { %600 = vmatprep.subr.mxu0 %v272_v17  ;;  %623 = vmatprep.subr.mxu1 %v272_v17 }
  0x7f   : > { %601 = vmatpush3.xpose.msra.mxu0 %v272_v17  ;;  %639 = vmatpush3.xpose.msra.mxu1 %v272_v17 }
  0x82   : > { %603 = vmatmul.mubr.f32.vlgmr.msra.gmra.mxu0 %v269_v18  ;;  %606 = vmatmul.mubr.f32.vlgmr.msra.gmra.mxu1 %v271_v19 }
 0x142   : > { %v604_v21 = vpop.f32.mrf.mxu0  ;;  %v607_v22 = vpop.f32.mrf.mxu1 }
 0x143   : > { %v396_v23 = vadd.f32 %v604_v21, %v544_v20  ;;  %v398_v24 = vadd.f32 %v607_v22, %v544_v20 }
 0x144   : > { %v354_v25 = vpop.f32.mrf.mxu0  ;;  %v364_v26 = vpop.f32.mrf.mxu1 }
 0x145   : > { %400 = vst [vmem:[%s249_s5 + $0x8] sm:$0xff] %v396_v23  ;;  %402 = vst [vmem:[%s249_s5 + $0x18] sm:$0xff] %v398_v24  ;;  %v395_v27 = vadd.f32 %v544_v20, %v354_v25  ;;  %v397_v28 = vadd.f32 %v544_v20, %v364_v26 }
 0x147   : > { %399 = vst [vmem:[%s249_s5] sm:$0xff] %v395_v27  ;;  %401 = vst [vmem:[%s249_s5 + $0x10] sm:$0xff] %v397_v28 }
 0x148   : > { %785 = shalt.err (!%p782_p5)
}
 0x149   : > { %s786_s27 = scalar_lea.hbm %s1048_s25, 512  ;;  %s790_s24 = scalar_lea.hbm %s1098_s3, 1536 }
 0x14a   : > { %p787_p7 = scmp.ne.s32.totalorder %s1048_s25, %s786_s27  ;;  %p791_p11 = scmp.lt.s32.totalorder %s1048_s25, %s1098_s3 }
 0x14b   : > { %p792_p10 = scmp.lt.s32.totalorder %s790_s24, %s786_s27 }
 0x14c   : > { %p788_p6 = pnand %p787_p7, %p1113_p8 }
 0x14d   : > { %p793_p1 = por %p792_p10, %p791_p11 }
 0x14e   : > { %p789_p9 = pneg %p788_p6 }
 0x150   : > { %p794_p4 = pnand %p793_p1, %p789_p9 }
 0x152   : > { %797 = shalt.err (!%p794_p4)
}
 0x153   : > { %s863_s5 = smov 128   ;;  %s864_s21 = smov 384  }
 0x154   : > { %s865_s10 = smov 8  }
 0x155   : > { %646 = dma.vmem_to_hbm [thread:$0]  (%p1113_p8), %s1043_s6, 512, %s1048_s25, %s404_s15, %s863_s5, %s864_s21, %s865_s10  }
 0x156 PF: > { %p663_p12 = scmp.ge.s32.totalorder %s856_s17, 2  ;;  %s434_s7 = sand.u32 1, %s836_s12  }
 0x157   : > { %p1114_p13 = scmp.ne.s32.totalorder %s1105_s23, 0  ;;  %s435_s8 = scalar_lea.sflag [#allocation5], %s434_s7 }
 0x159   : > { %p657_p0 = pnand %p663_p12, %p1114_p13 }
 0x15b   : > { %p658_p2 = pneg %p657_p0 }
 0x15d   : > { %831 = dma.done.wait (%p658_p2), %s435_s8, 512  }
 0x15e   : > { %833 = vsyncadd (%p658_p2), %s435_s8, 4294966784  ;;  %s20_s17 = sadd.s32 1, %s856_s17   ;;  %s1115_s12 = smov %s840_s13 }
 0x15f   : > { %p17_p3 = scmp.ge.s32.totalorder %s20_s17, 5   ;;  %s1116_s13 = smov %s844_s14 }
 0x160   : > { %s1117_s14 = smov %s984_s19  ;;  %s1118_s15 = smov %s852_s16 }
 0x161   : > { %s1119_s16 = smov %s1121_s28  ;;  %19 = sbr.rel (!%p17_p3) target bundleno = 7 (0x7), region = 94 }
 0x166   :  { %440 = vsyncpa [#allocation4], 1 }
 0x167   :  { %442 = vsyncpa [#allocation4 + $0x1], 1 }
 0x168   :  { %443 = vsyncpa [#allocation7], 1 }
 0x169   :  { %445 = vsyncpa [#allocation7 + $0x1], 1 }
 0x16a   :  { %446 = vsyncpa [#allocation5], 1 }
 0x16b   :  { %448 = vsyncpa [#allocation5 + $0x1], 1 }

</bundles_post_ra>
